<compile_context>
chip_gen: v7x
topology: tpu7x:2x2x1
jax: 0.10.0
libtpu: 0.0.40
codegen_flags: <defaults>
</compile_context>

<pallas_src>
import functools

import jax
import jax.numpy as jnp
from jax.experimental import pallas as pl
from jax.experimental.pallas import tpu as pltpu


def _dwconv_kernel(x_ref, top_ref, bot_ref, w_ref, b_ref, o_ref, *, C):
    """Depthwise 3x3 conv on a (TB, TH, W*C) tile (channels fused into the lane axis).

    x_ref  : (TB, TH, WC)    input rows of this tile (unpadded)
    top_ref: (TB, 1, 1, WC)  row just above the tile (zeros at the image top)
    bot_ref: (TB, 1, 1, WC)  row just below the tile (zeros at the image bottom)
    w_ref  : (9, WC)         per-tap weights replicated over W; taps whose contribution
                             would wrap across the W border are pre-zeroed (mask applied
                             on the INPUT column, since we pre-multiply before rolling)
    b_ref  : (1, WC)         bias replicated over W
    o_ref  : (TB, TH, WC)
    """
    TB, TH, WC = o_ref.shape
    f32 = jnp.float32

    x = x_ref[...].astype(f32)                 # (TB, TH, WC)
    top = top_ref[...].astype(f32)[:, 0]       # (TB, 1, WC)
    bot = bot_ref[...].astype(f32)[:, 0]       # (TB, 1, WC)
    w = w_ref[...].astype(f32)                 # (9, WC)
    b = b_ref[...].astype(f32)                 # (1, WC)

    # Row-shifted views: x_m[r] = x[r-1], x_p[r] = x[r+1]; tile-edge rows come from the
    # halo inputs.  The iota is (1, TH, 1) and broadcast inside the select (no full-tile
    # int32 iota / compares).
    if TH > 1:
        up = pltpu.roll(x, shift=1, axis=1)            # sublane roll (XLU)
        dn = pltpu.roll(x, shift=TH - 1, axis=1)
        row = jax.lax.broadcasted_iota(jnp.int32, (1, TH, 1), 1)
        x_m = jnp.where(row == 0, top, up)             # value at r from row r-1
        x_p = jnp.where(row == TH - 1, bot, dn)        # value at r from row r+1
    else:
        x_m = top
        x_p = bot

    # Pre-multiply-then-roll: three column partial sums, then exactly two lane rolls
    # (one image pixel == C lanes of the fused W*C axis).  Wrap-around columns are
    # killed by the input-column mask already folded into w.
    s_left = x_m * w[0] + x * w[3] + x_p * w[6]        # kw = 0 taps -> output col + 1
    s_mid = x_m * w[1] + x * w[4] + x_p * w[7] + b     # kw = 1 taps (+ bias)
    s_right = x_m * w[2] + x * w[5] + x_p * w[8]       # kw = 2 taps -> output col - 1

    acc = (s_mid
           + pltpu.roll(s_left, shift=C % WC, axis=2)
           + pltpu.roll(s_right, shift=(WC - C) % WC, axis=2))

    o_ref[...] = acc.astype(o_ref.dtype)


def _vmem_limit_bytes():
    """Generation-aware VMEM limit: ~70% of physical per-core VMEM, capped at 96 MiB
    (v5e/v6e: 128 MiB physical -> ~89 MiB; v7x: 64 MiB physical -> ~44 MiB)."""
    cap = None
    try:
        cap = int(pltpu.get_tpu_info().vmem_capacity_bytes)
    except Exception:
        cap = None
    if not cap or cap <= 0:
        cap = 64 * 1024 * 1024  # conservative default (v7x per-TC physical)
    return min(96 * 1024 * 1024, int(cap * 0.7))


def _pick_tiles(B, H, WC, itemsize, budget_bytes, sublane=8, min_grid_steps=2):
    """Largest (TB, TH) with TB | B, TH | H and TH sublane-aligned (or == H) that keeps
    double-buffered in/out blocks plus the kernel's f32 temporaries under the VMEM
    budget, preferring candidates with >= min_grid_steps grid steps (so v7x megacore has
    both cores busy and the DMA/compute pipeline can overlap)."""
    def divisors_desc(n):
        return [d for d in range(n, 0, -1) if n % d == 0]

    th_candidates = [d for d in divisors_desc(H) if d == H or d % sublane == 0]
    if not th_candidates:
        th_candidates = [H]

    # 2x double-buffered input + output blocks (4*itemsize) plus ~7 f32 full-tile
    # temporaries (x, x_m, x_p, s_left/s_mid/s_right, acc) materialized by the kernel.
    per_elem = 4 * itemsize + 7 * 4

    fallback = None
    for th in th_candidates:
        for tb in divisors_desc(B):
            if per_elem * tb * th * WC > budget_bytes:
                continue
            if fallback is None:
                fallback = (tb, th)
            if (B // tb) * (H // th) >= min_grid_steps:
                return tb, th
    if fallback is not None:
        return fallback
    return 1, th_candidates[-1]


def dwconv_pallas(x, H, W, weight, bias, *, tile_rows=None, tile_batch=None):
    """Depthwise 3x3 conv, padding=1 (PVTv2 DWConv forward).

    x: (B, N, C) with N == H*W;  weight: (C, 1, 3, 3) PyTorch OIHW depthwise;  bias: (C,).
    Returns (B, N, C) with the same dtype as x.
    """
    B, N, C = x.shape
    assert N == H * W, "sequence length must equal H*W"
    WC = W * C

    vmem_limit = _vmem_limit_bytes()
    itemsize = jnp.dtype(x.dtype).itemsize
    sublane = 8 if itemsize >= 4 else 16
    tb, th = _pick_tiles(
        B, H, WC, itemsize,
        budget_bytes=max(vmem_limit - 2 * 1024 * 1024, 4 * 1024 * 1024),
        sublane=sublane)
    if tile_rows is not None:
        th = tile_rows
    if tile_batch is not None:
        tb = tile_batch
    assert B % tb == 0 and H % th == 0

    # (B, N, C) -> (B, H, W*C): pure reshape (no transpose, no padded HBM copy).
    x_hwc = x.reshape(B, H, WC)

    # Halo rows for the H direction: tile t needs row t*th-1 (top) and t*th+th (bottom);
    # zeros at the true image border.  Built only when the image is actually row-tiled.
    # TODO(synk): read halo rows straight from x_hwc via element-indexed BlockSpecs to
    # drop this small wrapper-side gather when th < H.
    n_ht = H // th
    zero_row = jnp.zeros((B, 1, WC), x.dtype)
    if n_ht > 1:
        top_rows = x_hwc[:, th - 1:H - 1:th, :]          # (B, n_ht-1, WC)
        bot_rows = x_hwc[:, th:H:th, :]                  # (B, n_ht-1, WC)
        halo_top = jnp.concatenate([zero_row, top_rows], axis=1)
        halo_bot = jnp.concatenate([bot_rows, zero_row], axis=1)
    else:
        halo_top = zero_row
        halo_bot = zero_row
    halo_top = halo_top.reshape(B, n_ht, 1, WC)
    halo_bot = halo_bot.reshape(B, n_ht, 1, WC)

    # Per-tap weights: (C,1,3,3) -> (3,3,C), replicate over W, zero the taps whose
    # contribution would wrap across the W border (mask on the INPUT column, because the
    # kernel pre-multiplies before rolling), flatten to the fused W*C lane axis.
    wch = jnp.transpose(weight[:, 0, :, :], (1, 2, 0)).astype(jnp.float32)   # (3,3,C)
    w_rep = jnp.broadcast_to(wch[:, :, None, :], (3, 3, W, C))
    out_col = jnp.arange(W)[None, :] - (jnp.arange(3)[:, None] - 1)          # (3, W)
    wvalid = ((out_col >= 0) & (out_col < W)).astype(jnp.float32)
    w_flat = (w_rep * wvalid[None, :, :, None]).reshape(9, WC)
    b_flat = jnp.tile(bias.astype(jnp.float32), W).reshape(1, WC)

    grid = (B // tb, H // th)
    out = pl.pallas_call(
        functools.partial(_dwconv_kernel, C=C),
        out_shape=jax.ShapeDtypeStruct((B, H, WC), x.dtype),
        grid_spec=pltpu.PrefetchScalarGridSpec(
            num_scalar_prefetch=0,
            grid=grid,
            in_specs=[
                pl.BlockSpec((tb, th, WC), lambda bt, ht: (bt, ht, 0)),
                pl.BlockSpec((tb, 1, 1, WC), lambda bt, ht: (bt, ht, 0, 0)),
                pl.BlockSpec((tb, 1, 1, WC), lambda bt, ht: (bt, ht, 0, 0)),
                pl.BlockSpec((9, WC), lambda bt, ht: (0, 0)),   # fetched once
                pl.BlockSpec((1, WC), lambda bt, ht: (0, 0)),   # fetched once
            ],
            out_specs=pl.BlockSpec((tb, th, WC), lambda bt, ht: (bt, ht, 0)),
        ),
        compiler_params=pltpu.CompilerParams(
            dimension_semantics=("parallel", "parallel"),
            vmem_limit_bytes=vmem_limit,
        ),
    )(x_hwc, halo_top, halo_bot, w_flat, b_flat)

    return out.reshape(B, N, C)


def _reference(x, H, W, weight, bias):
    """Pure-JAX reference matching the PyTorch DWConv forward."""
    B, N, C = x.shape
    x_nchw = jnp.transpose(x, (0, 2, 1)).reshape(B, C, H, W).astype(jnp.float32)
    y = jax.lax.conv_general_dilated(
        x_nchw, weight.astype(jnp.float32),
        window_strides=(1, 1),
        padding=((1, 1), (1, 1)),
        dimension_numbers=("NCHW", "OIHW", "NCHW"),
        feature_group_count=C,
    )
    y = y + bias.astype(jnp.float32)[None, :, None, None]
    return jnp.transpose(y.reshape(B, C, H * W), (0, 2, 1))


# TODO(synk): the remaining Block ops (LayerNorms, q/kv/proj Linears, softmax attention,
# GELU, top-k scatter, dropout) are plain dense/XLA ops and are not re-implemented as
# Pallas kernels.
# TODO(synk): the H/W=7 PVTv2 stage-4 case (TH not a multiple of the sublane count) is
# not exercised here; validate the sublane roll path against the reference before use.

if __name__ == "__main__":
    key = jax.random.PRNGKey(0)
    kx, kw_, kb = jax.random.split(key, 3)

    # Config 1: f32, B=2, C=16, H=W=8 -> W*C = 128 lanes; grid splits over batch so the
    # pipeline (and v7x megacore) has >= 2 steps.
    B, C, H, W = 2, 16, 8, 8
    N = H * W
    x = jax.random.normal(kx, (B, N, C), dtype=jnp.float32)
    weight = jax.random.normal(kw_, (C, 1, 3, 3), dtype=jnp.float32) * 0.1
    bias = jax.random.normal(kb, (C,), dtype=jnp.float32) * 0.1

    out = jax.block_until_ready(dwconv_pallas(x, H, W, weight, bias))
    ref = _reference(x, H, W, weight, bias)
    assert out.shape == (B, N, C)
    assert jnp.allclose(out, ref, atol=1e-5, rtol=1e-5), "f32 mismatch vs reference"

    # Config 2: exercise the row-tiled (halo) path: H=16 split into two 8-row tiles.
    H2, W2 = 16, 8
    x2 = jax.random.normal(kx, (B, H2 * W2, C), dtype=jnp.float32)
    out2 = jax.block_until_ready(dwconv_pallas(x2, H2, W2, weight, bias, tile_rows=8))
    ref2 = _reference(x2, H2, W2, weight, bias)
    assert jnp.allclose(out2, ref2, atol=1e-5, rtol=1e-5), "row-tiled f32 mismatch"

    # Config 3: bf16 activations (halved HBM traffic), f32 accumulate inside the kernel.
    x_bf16 = x.astype(jnp.bfloat16)
    out_bf = jax.block_until_ready(dwconv_pallas(x_bf16, H, W, weight, bias))
    ref_bf = _reference(x_bf16.astype(jnp.float32), H, W, weight, bias)
    assert out_bf.dtype == jnp.bfloat16
    assert jnp.allclose(out_bf.astype(jnp.float32), ref_bf, atol=5e-2, rtol=5e-2), \
        "bf16 mismatch vs reference"

    # Config 4: wider channels (C=64 -> W*C = 512): lane rolls cross vreg boundaries.
    C4 = 64
    x4 = jax.random.normal(kx, (B, N, C4), dtype=jnp.float32)
    w4 = jax.random.normal(kw_, (C4, 1, 3, 3), dtype=jnp.float32) * 0.1
    b4 = jax.random.normal(kb, (C4,), dtype=jnp.float32) * 0.1
    out4 = jax.block_until_ready(dwconv_pallas(x4, H, W, w4, b4))
    ref4 = _reference(x4, H, W, w4, b4)
    assert jnp.allclose(out4, ref4, atol=1e-5, rtol=1e-5), "C=64 mismatch vs reference"

    print("KERNEL_OK")
</pallas_src>

<mosaic_0001>
module attributes {stable_mosaic.version = 11 : i64} {
  func.func @_dwconv_kernel(%arg0: i32, %arg1: i32, %arg2: memref<1x8x128xf32, #tpu.memory_space<vmem>>, %arg3: memref<1x1x1x128xf32, #tpu.memory_space<vmem>>, %arg4: memref<1x1x1x128xf32, #tpu.memory_space<vmem>>, %arg5: memref<9x128xf32, #tpu.memory_space<vmem>>, %arg6: memref<1x128xf32, #tpu.memory_space<vmem>>, %arg7: memref<1x8x128xf32, #tpu.memory_space<vmem>>) attributes {dimension_semantics = [#tpu.dimension_semantics<parallel>, #tpu.dimension_semantics<parallel>], iteration_bounds = array<i64: 2, 1>, scalar_prefetch = 0 : i64, scratch_operands = 0 : i64, tpu.core_type = #tpu.core_type<tc>, window_params = [{transform_indices = @transform_0, window_bounds = array<i64: 1, 8, 128>}, {transform_indices = @transform_1, window_bounds = array<i64: 1, 1, 1, 128>}, {transform_indices = @transform_2, window_bounds = array<i64: 1, 1, 1, 128>}, {pipeline_mode = #tpu.pipeline_mode<synchronous>, transform_indices = @transform_3, window_bounds = array<i64: 9, 128>}, {pipeline_mode = #tpu.pipeline_mode<synchronous>, transform_indices = @transform_4, window_bounds = array<i64: 1, 128>}, {transform_indices = @transform_5, window_bounds = array<i64: 1, 8, 128>}]} {
    %c0 = arith.constant 0 : index
    %c0_0 = arith.constant 0 : index
    %c0_1 = arith.constant 0 : index
    %0 = vector.load %arg2[%c0, %c0_0, %c0_1] : memref<1x8x128xf32, #tpu.memory_space<vmem>>, vector<1x8x128xf32>
    %c0_2 = arith.constant 0 : index
    %c0_3 = arith.constant 0 : index
    %c0_4 = arith.constant 0 : index
    %c0_5 = arith.constant 0 : index
    %1 = vector.load %arg3[%c0_2, %c0_3, %c0_4, %c0_5] : memref<1x1x1x128xf32, #tpu.memory_space<vmem>>, vector<1x1x1x128xf32>
    %2 = vector.shape_cast %1 : vector<1x1x1x128xf32> to vector<1x1x128xf32>
    %c0_6 = arith.constant 0 : index
    %c0_7 = arith.constant 0 : index
    %c0_8 = arith.constant 0 : index
    %c0_9 = arith.constant 0 : index
    %3 = vector.load %arg4[%c0_6, %c0_7, %c0_8, %c0_9] : memref<1x1x1x128xf32, #tpu.memory_space<vmem>>, vector<1x1x1x128xf32>
    %4 = vector.shape_cast %3 : vector<1x1x1x128xf32> to vector<1x1x128xf32>
    %c0_10 = arith.constant 0 : index
    %c0_11 = arith.constant 0 : index
    %5 = vector.load %arg5[%c0_10, %c0_11] : memref<9x128xf32, #tpu.memory_space<vmem>>, vector<9x128xf32>
    %c0_12 = arith.constant 0 : index
    %c0_13 = arith.constant 0 : index
    %6 = vector.load %arg6[%c0_12, %c0_13] : memref<1x128xf32, #tpu.memory_space<vmem>>, vector<1x128xf32>
    %c1_i32 = arith.constant 1 : i32
    %7 = tpu.dynamic_rotate %0 by %c1_i32 dim 1 : vector<1x8x128xf32>, i32 -> vector<1x8x128xf32>
    %c7_i32 = arith.constant 7 : i32
    %8 = tpu.dynamic_rotate %0 by %c7_i32 dim 1 : vector<1x8x128xf32>, i32 -> vector<1x8x128xf32>
    %9 = tpu.iota {dimensions = array<i32: 1>} : vector<1x8x1xi32>
    %c0_i32 = arith.constant 0 : i32
    %10 = vector.broadcast %c0_i32 : i32 to vector<1x8x1xi32>
    %11 = arith.cmpi eq, %9, %10 : vector<1x8x1xi32>
    %12 = vector.shape_cast %11 : vector<1x8x1xi1> to vector<1x8x1xi1>
    %13 = vector.broadcast %12 : vector<1x8x1xi1> to vector<1x8x128xi1>
    %14 = vector.shape_cast %2 : vector<1x1x128xf32> to vector<1x1x128xf32>
    %15 = vector.broadcast %14 : vector<1x1x128xf32> to vector<1x8x128xf32>
    %16 = arith.select %13, %15, %7 : vector<1x8x128xi1>, vector<1x8x128xf32>
    %c7_i32_14 = arith.constant 7 : i32
    %17 = vector.broadcast %c7_i32_14 : i32 to vector<1x8x1xi32>
    %18 = arith.cmpi eq, %9, %17 : vector<1x8x1xi32>
    %19 = vector.shape_cast %18 : vector<1x8x1xi1> to vector<1x8x1xi1>
    %20 = vector.broadcast %19 : vector<1x8x1xi1> to vector<1x8x128xi1>
    %21 = vector.shape_cast %4 : vector<1x1x128xf32> to vector<1x1x128xf32>
    %22 = vector.broadcast %21 : vector<1x1x128xf32> to vector<1x8x128xf32>
    %23 = arith.select %20, %22, %8 : vector<1x8x128xi1>, vector<1x8x128xf32>
    %24 = vector.extract_strided_slice %5 {offsets = [0, 0], sizes = [1, 128], strides = [1, 1]} : vector<9x128xf32> to vector<1x128xf32>
    %25 = vector.shape_cast %24 : vector<1x128xf32> to vector<128xf32>
    %26 = vector.shape_cast %25 : vector<128xf32> to vector<1x1x128xf32>
    %27 = vector.broadcast %26 : vector<1x1x128xf32> to vector<1x8x128xf32>
    %28 = arith.mulf %16, %27 : vector<1x8x128xf32>
    %29 = vector.extract_strided_slice %5 {offsets = [3, 0], sizes = [1, 128], strides = [1, 1]} : vector<9x128xf32> to vector<1x128xf32>
    %30 = vector.shape_cast %29 : vector<1x128xf32> to vector<128xf32>
    %31 = vector.shape_cast %30 : vector<128xf32> to vector<1x1x128xf32>
    %32 = vector.broadcast %31 : vector<1x1x128xf32> to vector<1x8x128xf32>
    %33 = arith.mulf %0, %32 : vector<1x8x128xf32>
    %34 = arith.addf %28, %33 : vector<1x8x128xf32>
    %35 = vector.extract_strided_slice %5 {offsets = [6, 0], sizes = [1, 128], strides = [1, 1]} : vector<9x128xf32> to vector<1x128xf32>
    %36 = vector.shape_cast %35 : vector<1x128xf32> to vector<128xf32>
    %37 = vector.shape_cast %36 : vector<128xf32> to vector<1x1x128xf32>
    %38 = vector.broadcast %37 : vector<1x1x128xf32> to vector<1x8x128xf32>
    %39 = arith.mulf %23, %38 : vector<1x8x128xf32>
    %40 = arith.addf %34, %39 : vector<1x8x128xf32>
    %41 = vector.extract_strided_slice %5 {offsets = [1, 0], sizes = [1, 128], strides = [1, 1]} : vector<9x128xf32> to vector<1x128xf32>
    %42 = vector.shape_cast %41 : vector<1x128xf32> to vector<128xf32>
    %43 = vector.shape_cast %42 : vector<128xf32> to vector<1x1x128xf32>
    %44 = vector.broadcast %43 : vector<1x1x128xf32> to vector<1x8x128xf32>
    %45 = arith.mulf %16, %44 : vector<1x8x128xf32>
    %46 = vector.extract_strided_slice %5 {offsets = [4, 0], sizes = [1, 128], strides = [1, 1]} : vector<9x128xf32> to vector<1x128xf32>
    %47 = vector.shape_cast %46 : vector<1x128xf32> to vector<128xf32>
    %48 = vector.shape_cast %47 : vector<128xf32> to vector<1x1x128xf32>
    %49 = vector.broadcast %48 : vector<1x1x128xf32> to vector<1x8x128xf32>
    %50 = arith.mulf %0, %49 : vector<1x8x128xf32>
    %51 = arith.addf %45, %50 : vector<1x8x128xf32>
    %52 = vector.extract_strided_slice %5 {offsets = [7, 0], sizes = [1, 128], strides = [1, 1]} : vector<9x128xf32> to vector<1x128xf32>
    %53 = vector.shape_cast %52 : vector<1x128xf32> to vector<128xf32>
    %54 = vector.shape_cast %53 : vector<128xf32> to vector<1x1x128xf32>
    %55 = vector.broadcast %54 : vector<1x1x128xf32> to vector<1x8x128xf32>
    %56 = arith.mulf %23, %55 : vector<1x8x128xf32>
    %57 = arith.addf %51, %56 : vector<1x8x128xf32>
    %58 = vector.shape_cast %6 : vector<1x128xf32> to vector<1x1x128xf32>
    %59 = vector.broadcast %58 : vector<1x1x128xf32> to vector<1x8x128xf32>
    %60 = arith.addf %57, %59 : vector<1x8x128xf32>
    %61 = vector.extract_strided_slice %5 {offsets = [2, 0], sizes = [1, 128], strides = [1, 1]} : vector<9x128xf32> to vector<1x128xf32>
    %62 = vector.shape_cast %61 : vector<1x128xf32> to vector<128xf32>
    %63 = vector.shape_cast %62 : vector<128xf32> to vector<1x1x128xf32>
    %64 = vector.broadcast %63 : vector<1x1x128xf32> to vector<1x8x128xf32>
    %65 = arith.mulf %16, %64 : vector<1x8x128xf32>
    %66 = vector.extract_strided_slice %5 {offsets = [5, 0], sizes = [1, 128], strides = [1, 1]} : vector<9x128xf32> to vector<1x128xf32>
    %67 = vector.shape_cast %66 : vector<1x128xf32> to vector<128xf32>
    %68 = vector.shape_cast %67 : vector<128xf32> to vector<1x1x128xf32>
    %69 = vector.broadcast %68 : vector<1x1x128xf32> to vector<1x8x128xf32>
    %70 = arith.mulf %0, %69 : vector<1x8x128xf32>
    %71 = arith.addf %65, %70 : vector<1x8x128xf32>
    %72 = vector.extract_strided_slice %5 {offsets = [8, 0], sizes = [1, 128], strides = [1, 1]} : vector<9x128xf32> to vector<1x128xf32>
    %73 = vector.shape_cast %72 : vector<1x128xf32> to vector<128xf32>
    %74 = vector.shape_cast %73 : vector<128xf32> to vector<1x1x128xf32>
    %75 = vector.broadcast %74 : vector<1x1x128xf32> to vector<1x8x128xf32>
    %76 = arith.mulf %23, %75 : vector<1x8x128xf32>
    %77 = arith.addf %71, %76 : vector<1x8x128xf32>
    %c16_i32 = arith.constant 16 : i32
    %78 = tpu.dynamic_rotate %40 by %c16_i32 dim 2 : vector<1x8x128xf32>, i32 -> vector<1x8x128xf32>
    %79 = arith.addf %60, %78 : vector<1x8x128xf32>
    %c112_i32 = arith.constant 112 : i32
    %80 = tpu.dynamic_rotate %77 by %c112_i32 dim 2 : vector<1x8x128xf32>, i32 -> vector<1x8x128xf32>
    %81 = arith.addf %79, %80 : vector<1x8x128xf32>
    %c0_15 = arith.constant 0 : index
    %c0_16 = arith.constant 0 : index
    %c0_17 = arith.constant 0 : index
    %82 = vector.load %arg7[%c0_15, %c0_16, %c0_17] : memref<1x8x128xf32, #tpu.memory_space<vmem>>, vector<1x8x128xf32>
    tpu.vector_store %arg7[%c0_15, %c0_16, %c0_17], %81 {strides = array<i32>} : memref<1x8x128xf32, #tpu.memory_space<vmem>>, vector<1x8x128xf32>,
    return
  }
  func.func @transform_0(%arg0: i32, %arg1: i32) -> (i32, i32, i32) {
    %c0_i32 = arith.constant 0 : i32
    %c0_i32_0 = arith.constant 0 : i32
    return %arg0, %arg1, %c0_i32 : i32, i32, i32
  }
  func.func @transform_1(%arg0: i32, %arg1: i32) -> (i32, i32, i32, i32) {
    %c0_i32 = arith.constant 0 : i32
    %c0_i32_0 = arith.constant 0 : i32
    %c0_i32_1 = arith.constant 0 : i32
    return %arg0, %arg1, %c0_i32, %c0_i32_0 : i32, i32, i32, i32
  }
  func.func @transform_2(%arg0: i32, %arg1: i32) -> (i32, i32, i32, i32) {
    %c0_i32 = arith.constant 0 : i32
    %c0_i32_0 = arith.constant 0 : i32
    %c0_i32_1 = arith.constant 0 : i32
    return %arg0, %arg1, %c0_i32, %c0_i32_0 : i32, i32, i32, i32
  }
  func.func @transform_3(%arg0: i32, %arg1: i32) -> (i32, i32) {
    %c0_i32 = arith.constant 0 : i32
    %c0_i32_0 = arith.constant 0 : i32
    %c0_i32_1 = arith.constant 0 : i32
    return %c0_i32, %c0_i32_0 : i32, i32
  }
  func.func @transform_4(%arg0: i32, %arg1: i32) -> (i32, i32) {
    %c0_i32 = arith.constant 0 : i32
    %c0_i32_0 = arith.constant 0 : i32
    %c0_i32_1 = arith.constant 0 : i32
    return %c0_i32, %c0_i32_0 : i32, i32
  }
  func.func @transform_5(%arg0: i32, %arg1: i32) -> (i32, i32, i32) {
    %c0_i32 = arith.constant 0 : i32
    %c0_i32_0 = arith.constant 0 : i32
    return %arg0, %arg1, %c0_i32 : i32, i32, i32
  }
}

</mosaic_0001>

<bundles_post_ra>
// kernel: tpu_custom_call.1
= control target key start
LH: loop header
LB: loop body
LE: loop exit
PB: predicated region body
PF: predicated region fallthrough
CT: control target
= control target key end

     0   :  { %10 = vsyncpa [#allocation3], 0  ;;  %s1055_s0 = inlined_call_operand.hbm [shape: f32[2,8,128], index: 0, kind: input, shape index: {}]   ;;  %s1056_s1 = inlined_call_operand.vmem [shape: f32[2,1,1,128], index: 1, kind: input, shape index: {}]   ;;  %s1057_s2 = inlined_call_operand.vmem [shape: f32[2,1,1,128], index: 2, kind: input, shape index: {}]   ;;  %s1058_s3 = inlined_call_operand.hbm [shape: f32[9,128], index: 3, kind: input, shape index: {}]   ;;  %s1059_s4 = inlined_call_operand.vmem [shape: f32[1,128], index: 4, kind: input, shape index: {}]   ;;  %s1060_s5 = inlined_call_operand.hbm [shape: f32[2,8,128], index: 5, kind: output, shape index: {}]  }
   0x1   :  { %12 = vsyncpa [#allocation3 + $0x1], 0 }
   0x2   :  { %13 = vsyncpa [#allocation6], 0 }
   0x3   :  { %14 = vsyncpa [#allocation4], 0 }
   0x4   :  { %16 = vsyncpa [#allocation4 + $0x1], 0  ;;  %s825_s18 = smov 0   ;;  %s827_s19 = smov 0  }
   0x5   :  { %s829_s20 = smov 0   ;;  %s831_s21 = smov 0  }
   0x6   :  { %s833_s22 = smov 0   ;;  %s835_s23 = smov 0  }
   0x7 LB: > { %s546_s24 = sadd.s32 4294967295, %s786_s23   ;;  %s547_s25 = sadd.s32 4294967294, %s786_s23   ;;  %s786_s23 = sphi %s835_s23, %s22_s23   ;;  %s782_s22 = sphi %s833_s22, %s1084_s22   ;;  %s778_s21 = sphi %s831_s21, %s1083_s21   ;;  %s774_s20 = sphi %s829_s20, %s1082_s20   ;;  %s770_s19 = sphi %s827_s19, %s1081_s19   ;;  %s766_s18 = sphi %s825_s18, %s1080_s18  }
   0x8   : > { %p56_p0 = scmp.ne.s32.totalorder %s770_s19, %s766_s18  ;;  %p859_p1 = scmp.eq.s32.totalorder %s546_s24, 0 }
   0x9   : > { %p863_p2 = scmp.eq.s32.totalorder %s546_s24, 1  ;;  %p186_p3 = scmp.eq.s32.totalorder %s547_s25, 1 }
   0xa   : > { %s1065_s26 = scalar_select %p859_p1, 1, 0 }
   0xb   : > { %s1066_s27 = scalar_select %p863_p2, 1, 0 }
   0xc   : > { %p869_p4 = por %p859_p1, %p56_p0  ;;  %p548_p5 = scmp.ge.s32.totalorder %s786_s23, 1 }
   0xd   : > { %p874_p6 = por %p186_p3, %p56_p0  ;;  %p193_p7 = scmp.lt.s32.totalorder %s786_s23, 3 }
   0xe   : > { %s1067_s28 = scalar_select %p869_p4, 1, 0 }
   0xf   : > { %s1068_s29 = scalar_select %p874_p6, 1, 0 }
  0x10   : > { %p879_p8 = pnand %p548_p5, %p193_p7  ;;  %s788_s6 = smov [#allocation5]  }
  0x11   : > { %s205_s7 = sshll.u32 %s788_s6, 4  ;;  %s34_s9 = sadd.s32 1, %s782_s22  ;;  %s206_s7 = int_to_ptr.vmem [resolvable:$true] %s205_s7 }
  0x12   : > { %s1069_s30 = scalar_select %p879_p8, 1, 0 }
  0x13   : > { %p573_p9 = pneg %p879_p8  ;;  %s642_s12 = scalar_lea.hbm %s1058_s3, 256 }
  0x14   : > { %p643_p12 = scmp.ne.s32.totalorder %s1058_s3, %s642_s12  ;;  %p649_p5 = scmp.lt.u32.totalorder %s642_s12, %s1058_s3 }
  0x15   : > { %p888_p11 = pnand %p573_p9, %p859_p1 }
  0x17   : > { %p644_p13 = pneg %p888_p11 }
  0x19   : > { %p645_p0 = pnand %p644_p13, %p643_p12 }
  0x1b   : > { %p646_p3 = pneg %p645_p0 }
  0x1d   : > { %p651_p7 = pnand %p649_p5, %p646_p3 }
  0x1f   : > { %654 = shalt.err (!%p651_p7)
}
  0x20   : > { %s655_s17 = scalar_lea.vmem %s206_s7, 256  ;;  %p663_p1 = scmp.lt.s32.totalorder %s206_s7, %s206_s7 }
  0x21   : > { %p656_p9 = scmp.ne.s32.totalorder %s206_s7, %s655_s17  ;;  %p664_p4 = scmp.lt.s32.totalorder %s655_s17, %s655_s17 }
  0x23   : > { %p658_p10 = pnand %p656_p9, %p644_p13  ;;  %p665_p8 = por %p664_p4, %p663_p1 }
  0x25   : > { %p659_p6 = pneg %p658_p10 }
  0x27   : > { %p666_p2 = pnand %p665_p8, %p659_p6 }
  0x29   : > { %669 = shalt.err (!%p666_p2)
}
  0x2a   : > { %s789_s24 = smov 128   ;;  %s790_s25 = smov 8  }
  0x2b   : > { %576 = dma.hbm_to_vmem [thread:$0]  (!%p888_p11), %s1058_s3, 256, %s206_s7, [#allocation6], %s789_s24, %s789_s24, %s790_s25  }
  0x2c   : > { %p36_p1 = scmp.ge.s32.totalorder %s34_s9, 2  ;;  %s43_s11 = sadd.s32 1, %s774_s20 }
  0x2d   : > { %p50_p2 = scmp.ne.s32.totalorder %s774_s20, %s770_s19  ;;  %p51_p4 = scmp.eq.s32.totalorder %s786_s23, 0 }
  0x2e   : > { %s1086_s9 = smov (%p36_p1, %s34_s9), 0  ;;  %p1072_p8 = scmp.ne.s32.totalorder %s1066_s27, 0 }
  0x2f   : > { %p915_p6 = por %p51_p4, %p50_p2  ;;  %s38_s8 = ssub.s32 %s782_s22, %s1086_s9 }
  0x30   : > { %p921_p10 = por %p1072_p8, %p50_p2  ;;  %p586_p12 = scmp.lt.s32.totalorder %s786_s23, 2 }
  0x31   : > { %p41_p11 = scmp.eq.s32.totalorder %s38_s8, 0  ;;  %s222_s7 = sand.u32 1, %s774_s20  }
  0x32   : > { %s551_s14 = sshll.u32 %s222_s7, 3  ;;  %s552_s16 = sshll.u32 %s782_s22, 7 }
  0x33   : > { %s930_s15 = scalar_select %p41_p11, %s774_s20, %s43_s11  }
  0x34   : > { %s936_s25 = scalar_lea.hbm %s1055_s0, %s552_s16  ;;  %s226_s27 = scalar_lea.vmem [#allocation2], %s551_s14 }
  0x35   : > { %s234_s6 = sshll.u32 %s226_s27, 4  ;;  %p942_p13 = pnand %p586_p12, %p915_p6  ;;  %s938_s6 = int_to_ptr.vmem [resolvable:$true] %s234_s6 }
  0x36   : > { %s223_s11 = scalar_lea.sflag [#allocation3], %s222_s7  ;;  %s670_s8 = scalar_lea.hbm %s936_s25, 128 }
  0x37   : > { %p671_p0 = scmp.ne.s32.totalorder %s936_s25, %s670_s8  ;;  %p672_p3 = pneg %p942_p13 }
  0x38   : > { %s675_s17 = scalar_lea.hbm %s1055_s0, 256  ;;  %p676_p9 = scmp.lt.u32.totalorder %s936_s25, %s1055_s0 }
  0x39   : > { %p673_p5 = pnand %p672_p3, %p671_p0  ;;  %p677_p1 = scmp.lt.u32.totalorder %s675_s17, %s670_s8 }
  0x3a   : > { %p679_p4 = scmp.lt.u32.totalorder %s670_s8, %s936_s25 }
  0x3b   : > { %p674_p7 = pneg %p673_p5  ;;  %p678_p2 = por %p677_p1, %p676_p9 }
  0x3d   : > { %p680_p6 = por %p679_p4, %p678_p2 }
  0x3f   : > { %p681_p8 = pnand %p680_p6, %p674_p7 }
  0x41   : > { %684 = shalt.err (!%p681_p8)
}
  0x42   : > { %s685_s7 = scalar_lea.vmem %s938_s6, 128  ;;  %s791_s27 = smov [#allocation2]  }
  0x43   : > { %p686_p12 = scmp.ne.s32.totalorder %s938_s6, %s685_s7  ;;  %s690_s14 = sshll.u32 %s791_s27, 4  ;;  %s691_s14 = int_to_ptr.vmem [resolvable:$false] %s690_s14 }
  0x44   : > { %s692_s16 = scalar_lea.vmem %s691_s14, 256  ;;  %p693_p5 = scmp.lt.s32.totalorder %s938_s6, %s691_s14 }
  0x45   : > { %p688_p11 = pnand %p686_p12, %p672_p3  ;;  %p694_p9 = scmp.lt.s32.totalorder %s692_s16, %s685_s7 }
  0x47   : > { %p689_p0 = pneg %p688_p11  ;;  %p695_p1 = por %p694_p9, %p693_p5 }
  0x49   : > { %p696_p2 = pnand %p695_p1, %p689_p0 }
  0x4b   : > { %699 = shalt.err (!%p696_p2)
}
  0x4c   : > { %580 = dma.hbm_to_vmem [thread:$0]  (!%p942_p13), %s936_s25, 128, %s938_s6, %s223_s11  }
  0x4d   : > { %p1075_p7 = scmp.ne.s32.totalorder %s1069_s30, 0 }
  0x4e   : > { %s974_s8 = sand.u32 (!%p1075_p7), 1, %s770_s19   ;;  %p1076_p3 = scmp.ne.s32.totalorder (!%p1075_p7), %s1067_s28, 0 }
  0x4f   : > { %261 = sbr.rel (%p1075_p7) target bundleno = 239 (0xef), region = 40  ;;  %s554_s17 = sshll.u32 (!%p1075_p7), %s974_s8, 3 }
  0x50   : > { %s264_s12 = scalar_lea.sflag (!%p1075_p7), [#allocation3], %s974_s8  ;;  %s267_s24 = scalar_lea.vmem (!%p1075_p7), [#allocation2], %s554_s17 }
  0x56   : > { %753 = dma.done.wait (%p1076_p3), %s264_s12, 128  }
  0x57   : > { %755 = vsyncadd (%p1076_p3), %s264_s12, 4294967168  ;;  %p1077_p13 = scmp.ne.s32.totalorder %s1065_s26, 0 }
  0x59   : > { %757 = dma.done.wait (%p1077_p13), [#allocation6], 256  }
  0x5a   : > { %759 = vsyncadd (%p1077_p13), [#allocation6], 4294967040  ;;  %p310_p4 = scmp.lt.s32.totalorder %s778_s21, 1  ;;  %v330_v0 = vlaneseq  ;;  %v322_v8 = vld [vmem:[%s267_s24] sm:$0xff]  ;;  %v325_v11 = vld [vmem:[#allocation5] sm:$0xff]  ;;  %s792_s26 = smov 16  }
  0x5b   : > { %v328_v12 = vrot.slane %v322_v8, 7  ;;  %v329_v13 = vrot.slane %v322_v8, 1  ;;  %v560_v22 = vld [vmem:[#allocation5 + $0x8] ss:$0 sm:$0xff]  ;;  %s793_s27 = smov 112   ;;  %s562_s12 = sshll.u32 %s778_s21, 7 }
  0x5c   : > { %s311_s30 = scalar_select %p310_p4, %s778_s21, 1  ;;  %v331_v1 = vshrl.u32 %v330_v0, 7  ;;  %v559_v42 = vld [vmem:[%s1059_s4] ss:$0 sm:$0xff] }
  0x5d   : > { %s309_s24 = scalar_lea.vmem [#allocation7], %s554_s17  ;;  %s418_s11 = scalar_lea.sflag [#allocation4], %s974_s8 }
  0x5e   : > { %s315_s10 = scalar_lea.vmem %s1056_s1, %s311_s30  ;;  %s321_s28 = scalar_lea.vmem %s1057_s2, %s311_s30  ;;  %v354_v2 = vsub.s32 0, %v331_v1  ;;  %v359_v3 = vsub.s32 3, %v331_v1  ;;  %v365_v4 = vsub.s32 6, %v331_v1  ;;  %v395_v5 = vsub.s32 2, %v331_v1 }
  0x5f   : > { %vm332_vm0 = vcmp.eq.s32.totalorder %v331_v1, 0  ;;  %v400_v6 = vsub.s32 5, %v331_v1  ;;  %v371_v7 = vsub.s32 1, %v331_v1  ;;  %v557_v9 = vld [vmem:[%s315_s10] ss:$0 sm:$0xff]  ;;  %vm342_vm1 = vcmp.eq.s32.totalorder %v331_v1, 7  ;;  %s1006_s10 = scalar_lea.hbm %s1060_s5, %s562_s12 }
  0x60   : > { %v558_v10 = vld [vmem:[%s321_s28] ss:$0 sm:$0xff]  ;;  %v376_v14 = vsub.s32 4, %v331_v1  ;;  %v382_v15 = vsub.s32 7, %v331_v1  ;;  %v355_v16 = vrot.slane %v325_v11, %v354_v2  ;;  %v360_v17 = vrot.slane %v325_v11, %v359_v3  ;;  %s432_s30 = sshll.u32 %s309_s24, 4  ;;  %s794_s21 = smov [#allocation7]   ;;  %s1008_s30 = int_to_ptr.vmem [resolvable:$true] %s432_s30 }
  0x61   : > { %v366_v18 = vrot.slane %v325_v11, %v365_v4  ;;  %v396_v19 = vrot.slane %v325_v11, %v395_v5  ;;  %v341_v20 = vsel %vm332_vm0, %v557_v9, %v328_v12  ;;  %v351_v21 = vsel %vm342_vm1, %v558_v10, %v329_v13  ;;  %s700_s7 = scalar_lea.vmem %s1008_s30, 128  ;;  %s704_s17 = sshll.u32 %s794_s21, 4  ;;  %s705_s17 = int_to_ptr.vmem [resolvable:$false] %s704_s17 }
  0x62   : > { %v401_v23 = vrot.slane %v325_v11, %v400_v6  ;;  %v372_v24 = vrot.slane %v325_v11, %v371_v7  ;;  %v356_v25 = vmul.f32 %v355_v16, %v341_v20  ;;  %v361_v26 = vmul.f32 %v360_v17, %v322_v8  ;;  %p701_p6 = scmp.ne.s32.totalorder %s1008_s30, %s700_s7  ;;  %s706_s28 = scalar_lea.vmem %s705_s17, 256 }
  0x63   : > { %v367_v27 = vmul.f32 %v366_v18, %v351_v21  ;;  %v397_v28 = vmul.f32 %v396_v19, %v341_v20  ;;  %v377_v31 = vrot.slane %v325_v11, %v376_v14  ;;  %v408_v33 = vmul.f32 %v560_v22, %v351_v21  ;;  %p707_p11 = scmp.lt.s32.totalorder %s1008_s30, %s705_s17  ;;  %p708_p0 = scmp.lt.s32.totalorder %s706_s28, %s700_s7 }
  0x64   : > { %v402_v29 = vmul.f32 %v401_v23, %v322_v8  ;;  %v373_v30 = vmul.f32 %v372_v24, %v341_v20  ;;  %v362_v32 = vadd.f32 %v361_v26, %v356_v25  ;;  %v383_v34 = vrot.slane %v325_v11, %v382_v15  ;;  %p702_p8 = pnand %p701_p6, %p921_p10 }
  0x65   : > { %v378_v36 = vmul.f32 %v377_v31, %v322_v8  ;;  %p709_p5 = por %p708_p0, %p707_p11 }
  0x66   : > { %v403_v35 = vadd.f32 %v402_v29, %v397_v28  ;;  %v368_v37 = vadd.f32 %v367_v27, %v362_v32  ;;  %v384_v38 = vmul.f32 %v383_v34, %v351_v21  ;;  %p703_p12 = pneg %p702_p8 }
  0x67   : > { %v379_v39 = vadd.f32 %v378_v36, %v373_v30 }
  0x68   : > { %410 = vrot.lane.b32.xlu0 %v368_v37, %s792_s26  ;;  %v409_v40 = vadd.f32 %v408_v33, %v403_v35  ;;  %p710_p9 = pnand %p709_p5, %p703_p12 }
  0x69   : > { %v385_v41 = vadd.f32 %v384_v38, %v379_v39 }
  0x6b   : > { %v392_v43 = vadd.f32 %v559_v42, %v385_v41 }
  0x6c   : > { %413 = vrot.lane.b32.xlu0 %v409_v40, %s793_s27 }
  0xda   : > { %v411_v44 = vpop.permute.xlu0 %410 }
  0xdb   : > { %v412_v45 = vadd.f32 %v411_v44, %v392_v43 }
  0xde   : > { %v414_v46 = vpop.permute.xlu0 %413 }
  0xdf   : > { %v415_v47 = vadd.f32 %v414_v46, %v412_v45 }
  0xe1   : > { %416 = vst [vmem:[%s309_s24] sm:$0xff] %v415_v47 }
  0xe2   : > { %713 = shalt.err (!%p710_p9)
}
  0xe3   : > { %s714_s8 = scalar_lea.hbm %s1006_s10, 128  ;;  %s718_s14 = scalar_lea.hbm %s1060_s5, 256 }
  0xe4   : > { %p715_p1 = scmp.ne.s32.totalorder %s1006_s10, %s714_s8  ;;  %p719_p3 = scmp.lt.u32.totalorder %s1006_s10, %s1060_s5 }
  0xe5   : > { %p720_p13 = scmp.lt.u32.totalorder %s718_s14, %s714_s8  ;;  %p722_p6 = scmp.lt.u32.totalorder %s714_s8, %s1006_s10 }
  0xe6   : > { %p716_p2 = pnand %p715_p1, %p921_p10 }
  0xe7   : > { %p721_p4 = por %p720_p13, %p719_p3 }
  0xe8   : > { %p717_p7 = pneg %p716_p2 }
  0xe9   : > { %p723_p8 = por %p722_p6, %p721_p4 }
  0xeb   : > { %p724_p12 = pnand %p723_p8, %p717_p7 }
  0xed   : > { %727 = shalt.err (!%p724_p12)
}
  0xee   : > { %571 = dma.vmem_to_hbm [thread:$0]  (%p921_p10), %s1008_s30, 128, %s1006_s10, %s418_s11  }
  0xef PF: > { %s444_s24 = sand.u32 1, %s766_s18   ;;  %p1078_p11 = scmp.ne.s32.totalorder %s1068_s29, 0 }
  0xf0   : > { %p1079_p0 = scmp.ge.s32.totalorder %s786_s23, 2  ;;  %s445_s25 = scalar_lea.sflag [#allocation4], %s444_s24 }
  0xf2   : > { %p582_p5 = pnand %p1079_p0, %p1078_p11 }
  0xf4   : > { %761 = dma.done.wait (!%p582_p5), %s445_s25, 128  }
  0xf5   : > { %763 = vsyncadd (!%p582_p5), %s445_s25, 4294967168  ;;  %s22_s23 = sadd.s32 1, %s786_s23   ;;  %s1080_s18 = smov %s770_s19 }
  0xf6   : > { %p19_p9 = scmp.ge.s32.totalorder %s22_s23, 4   ;;  %s1081_s19 = smov %s774_s20 }
  0xf7   : > { %s1082_s20 = smov %s930_s15  ;;  %s1083_s21 = smov %s782_s22 }
  0xf8   : > { %s1084_s22 = smov %s1086_s9  ;;  %21 = sbr.rel (!%p19_p9) target bundleno = 7 (0x7), region = 95 }
  0xff   :  { %450 = vsyncpa [#allocation3], 1 }
 0x100   :  { %452 = vsyncpa [#allocation3 + $0x1], 1 }
 0x101   :  { %453 = vsyncpa [#allocation6], 1 }
 0x102   :  { %454 = vsyncpa [#allocation4], 1 }
 0x103   :  { %456 = vsyncpa [#allocation4 + $0x1], 1 }

</bundles_post_ra>
